<compile_context>
chip_gen: v7x
topology: tpu7x:2x2x1
jax: 0.10.0
libtpu: 0.0.40
codegen_flags: <defaults>
</compile_context>

<pallas_src>
import functools

import jax
import jax.numpy as jnp
from jax.experimental import pallas as pl
from jax.experimental.pallas import tpu as pltpu


# -----------------------------------------------------------------------------
# Kernel: y = relu((x @ w) * scale + shift)
# -----------------------------------------------------------------------------
def _fc_bn_relu_kernel(x_ref, w_ref, s_ref, t_ref, o_ref):
    h = jnp.dot(x_ref[...], w_ref[...], preferred_element_type=jnp.float32)
    o_ref[...] = jnp.maximum(h * s_ref[...] + t_ref[...], 0.0)


def fc_layer_forward(x, w, scale, shift, *, tb=128):
    """Fused Linear + (folded) BatchNorm1d + ReLU.

    x:     (B, in_ch)  float32
    w:     (in_ch, out_ch)  float32   (== torch Linear weight transposed)
    scale: (out_ch,)   float32   gamma / sqrt(var + eps)          (ones if bn=False)
    shift: (out_ch,)   float32   (bias - mean) * scale + beta     (bias if bn=False)
    """
    B, in_ch = x.shape
    out_ch = w.shape[1]

    # Pick a batch tile: >= 8 sublanes, <= requested tb; pad B up to a multiple.
    tb = int(min(tb, max(8, B)))
    Bp = pl.cdiv(B, tb) * tb
    if Bp != B:
        x = jnp.pad(x, ((0, Bp - B), (0, 0)))

    scale2 = scale.reshape(1, out_ch).astype(jnp.float32)
    shift2 = shift.reshape(1, out_ch).astype(jnp.float32)

    out = pl.pallas_call(
        _fc_bn_relu_kernel,
        out_shape=jax.ShapeDtypeStruct((Bp, out_ch), jnp.float32),
        grid_spec=pltpu.PrefetchScalarGridSpec(
            num_scalar_prefetch=0,
            grid=(Bp // tb,),
            in_specs=[
                pl.BlockSpec((tb, in_ch), lambda i: (i, 0)),      # x tile
                pl.BlockSpec((in_ch, out_ch), lambda i: (0, 0)),  # weight (resident)
                pl.BlockSpec((1, out_ch), lambda i: (0, 0)),      # scale  (resident)
                pl.BlockSpec((1, out_ch), lambda i: (0, 0)),      # shift  (resident)
            ],
            out_specs=pl.BlockSpec((tb, out_ch), lambda i: (i, 0)),
        ),
        compiler_params=pltpu.CompilerParams(
            dimension_semantics=("parallel",)),
    )(x, w, scale2, shift2)

    return out[:B]


# -----------------------------------------------------------------------------
# Deterministic synthetic parameters + BN folding (eval mode)
# -----------------------------------------------------------------------------
def init_params(key, in_ch, out_ch, bn=True, eps=1e-5):
    kw, kb, kg, kbe, km, kv = jax.random.split(key, 6)
    w = 0.1 * jax.random.normal(kw, (in_ch, out_ch), jnp.float32)
    b = 0.1 * jax.random.normal(kb, (out_ch,), jnp.float32)
    if not bn:
        return w, jnp.ones((out_ch,), jnp.float32), b
    gamma = 1.0 + 0.1 * jax.random.normal(kg, (out_ch,), jnp.float32)
    beta = 0.1 * jax.random.normal(kbe, (out_ch,), jnp.float32)
    mean = 0.1 * jax.random.normal(km, (out_ch,), jnp.float32)
    var = jax.random.uniform(kv, (out_ch,), jnp.float32, 0.5, 1.5)
    inv = gamma / jnp.sqrt(var + eps)
    scale = inv
    shift = (b - mean) * inv + beta
    return w, scale, shift


if __name__ == "__main__":
    B, IN_CH, OUT_CH = 256, 64, 128
    key = jax.random.PRNGKey(0)
    kx, kp = jax.random.split(key)
    x = jax.random.normal(kx, (B, IN_CH), dtype=jnp.float32)
    w, scale, shift = init_params(kp, IN_CH, OUT_CH, bn=True)

    fwd = jax.jit(functools.partial(fc_layer_forward, tb=128))
    y = fwd(x, w, scale, shift)
    jax.block_until_ready(y)

    # Pure-JAX reference for the fused Linear+BN(eval)+ReLU.
    ref = jnp.maximum((x @ w) * scale.reshape(1, -1) + shift.reshape(1, -1), 0.0)

    assert y.shape == (B, OUT_CH) and y.dtype == jnp.float32
    assert jnp.allclose(y, ref, atol=1e-4, rtol=1e-4), float(jnp.max(jnp.abs(y - ref)))
    print("KERNEL_OK")
</pallas_src>

<mosaic_0001>
module attributes {stable_mosaic.version = 11 : i64} {
  func.func @_fc_bn_relu_kernel(%arg0: i32, %arg1: memref<128x64xf32, #tpu.memory_space<vmem>>, %arg2: memref<64x128xf32, #tpu.memory_space<vmem>>, %arg3: memref<1x128xf32, #tpu.memory_space<vmem>>, %arg4: memref<1x128xf32, #tpu.memory_space<vmem>>, %arg5: memref<128x128xf32, #tpu.memory_space<vmem>>) attributes {dimension_semantics = [#tpu.dimension_semantics<parallel>], iteration_bounds = array<i64: 2>, scalar_prefetch = 0 : i64, scratch_operands = 0 : i64, tpu.core_type = #tpu.core_type<tc>, window_params = [{transform_indices = @transform_0, window_bounds = array<i64: 128, 64>}, {pipeline_mode = #tpu.pipeline_mode<synchronous>, transform_indices = @transform_1, window_bounds = array<i64: 64, 128>}, {pipeline_mode = #tpu.pipeline_mode<synchronous>, transform_indices = @transform_2, window_bounds = array<i64: 1, 128>}, {pipeline_mode = #tpu.pipeline_mode<synchronous>, transform_indices = @transform_3, window_bounds = array<i64: 1, 128>}, {transform_indices = @transform_4, window_bounds = array<i64: 128, 128>}]} {
    %c0 = arith.constant 0 : index
    %c0_0 = arith.constant 0 : index
    %0 = vector.load %arg1[%c0, %c0_0] : memref<128x64xf32, #tpu.memory_space<vmem>>, vector<128x64xf32>
    %c0_1 = arith.constant 0 : index
    %c0_2 = arith.constant 0 : index
    %1 = vector.load %arg2[%c0_1, %c0_2] : memref<64x128xf32, #tpu.memory_space<vmem>>, vector<64x128xf32>
    %cst = arith.constant dense<0.000000e+00> : vector<128x128xf32>
    %2 = tpu.matmul %0, %1, %cst {dimension_numbers = #tpu.dot_dimension_numbers<[1], [0], [0], [1], [0, 0, 1, 1], [], []>} : vector<128x64xf32>, vector<64x128xf32>, vector<128x128xf32> -> vector<128x128xf32>
    %c0_3 = arith.constant 0 : index
    %c0_4 = arith.constant 0 : index
    %3 = vector.load %arg3[%c0_3, %c0_4] : memref<1x128xf32, #tpu.memory_space<vmem>>, vector<1x128xf32>
    %4 = vector.broadcast %3 : vector<1x128xf32> to vector<128x128xf32>
    %5 = arith.mulf %2, %4 : vector<128x128xf32>
    %c0_5 = arith.constant 0 : index
    %c0_6 = arith.constant 0 : index
    %6 = vector.load %arg4[%c0_5, %c0_6] : memref<1x128xf32, #tpu.memory_space<vmem>>, vector<1x128xf32>
    %7 = vector.broadcast %6 : vector<1x128xf32> to vector<128x128xf32>
    %8 = arith.addf %5, %7 : vector<128x128xf32>
    %cst_7 = arith.constant 0.000000e+00 : f32
    %9 = vector.broadcast %cst_7 : f32 to vector<128x128xf32>
    %10 = arith.maximumf %8, %9 : vector<128x128xf32>
    %c0_8 = arith.constant 0 : index
    %c0_9 = arith.constant 0 : index
    %11 = vector.load %arg5[%c0_8, %c0_9] : memref<128x128xf32, #tpu.memory_space<vmem>>, vector<128x128xf32>
    tpu.vector_store %arg5[%c0_8, %c0_9], %10 {strides = array<i32>} : memref<128x128xf32, #tpu.memory_space<vmem>>, vector<128x128xf32>,
    return
  }
  func.func @transform_0(%arg0: i32) -> (i32, i32) {
    %c0_i32 = arith.constant 0 : i32
    %c0_i32_0 = arith.constant 0 : i32
    return %arg0, %c0_i32 : i32, i32
  }
  func.func @transform_1(%arg0: i32) -> (i32, i32) {
    %c0_i32 = arith.constant 0 : i32
    %c0_i32_0 = arith.constant 0 : i32
    %c0_i32_1 = arith.constant 0 : i32
    return %c0_i32, %c0_i32_0 : i32, i32
  }
  func.func @transform_2(%arg0: i32) -> (i32, i32) {
    %c0_i32 = arith.constant 0 : i32
    %c0_i32_0 = arith.constant 0 : i32
    %c0_i32_1 = arith.constant 0 : i32
    return %c0_i32, %c0_i32_0 : i32, i32
  }
  func.func @transform_3(%arg0: i32) -> (i32, i32) {
    %c0_i32 = arith.constant 0 : i32
    %c0_i32_0 = arith.constant 0 : i32
    %c0_i32_1 = arith.constant 0 : i32
    return %c0_i32, %c0_i32_0 : i32, i32
  }
  func.func @transform_4(%arg0: i32) -> (i32, i32) {
    %c0_i32 = arith.constant 0 : i32
    %c0_i32_0 = arith.constant 0 : i32
    return %arg0, %c0_i32 : i32, i32
  }
}

</mosaic_0001>

<bundles_post_ra>
// kernel: fc_layer_forward.1
= control target key start
LH: loop header
LB: loop body
LE: loop exit
PB: predicated region body
PF: predicated region fallthrough
CT: control target
= control target key end

     0   :  { %9 = vsyncpa [#allocation3], 0  ;;  %s1048_s0 = inlined_call_operand.vmem [shape: f32[256,64], index: 0, kind: input, shape index: {}]   ;;  %s1049_s1 = inlined_call_operand.vmem [shape: f32[64,128], index: 1, kind: input, shape index: {}]   ;;  %s1050_s2 = inlined_call_operand.vmem [shape: f32[1,128], index: 2, kind: input, shape index: {}]   ;;  %s1051_s3 = inlined_call_operand.vmem [shape: f32[1,128], index: 3, kind: input, shape index: {}]   ;;  %s1052_s4 = inlined_call_operand.hbm [shape: f32[256,128], index: 4, kind: output, shape index: {}]  }
   0x1   :  { %11 = vsyncpa [#allocation3 + $0x1], 0  ;;  %s823_s15 = smov 0   ;;  %s825_s16 = smov 0  }
   0x2   :  { %s827_s17 = smov 0   ;;  %s829_s18 = smov 0  }
   0x3 LB: > { %s844_s19 = sadd.s32 4294967295, %s793_s18   ;;  %s571_s20 = sadd.s32 4294967294, %s793_s18   ;;  %s793_s18 = sphi %s829_s18, %s1058_s18   ;;  %s789_s17 = sphi %s827_s17, %s1057_s17   ;;  %s785_s16 = sphi %s825_s16, %s1056_s16   ;;  %s781_s15 = sphi %s823_s15, %s1055_s15  }
   0x4   : > { %s848_s21 = sadd.s32 1, %s793_s18   ;;  %s113_s22 = sadd.s32 1, %s789_s17 }
   0x5   : > { %s110_s23 = ssub.s32 %s793_s18, %s848_s21  ;;  %p123_p0 = scmp.ne.s32.totalorder %s789_s17, %s785_s16 }
   0x6   : > { %p111_p1 = scmp.eq.s32.totalorder %s110_s23, 0  ;;  %p124_p2 = scmp.eq.s32.totalorder %s844_s19, 1 }
   0x7   : > { %p129_p3 = scmp.ne.s32.totalorder %s785_s16, %s781_s15  ;;  %p130_p4 = scmp.eq.s32.totalorder %s571_s20, 1 }
   0x8   : > { %s859_s24 = scalar_select %p111_p1, %s789_s17, %s113_s22  }
   0x9   : > { %p861_p5 = por %p124_p2, %p123_p0  ;;  %p865_p6 = por %p130_p4, %p129_p3 }
   0xa   : > { %p574_p7 = scmp.ge.s32.totalorder %s793_s18, 1  ;;  %p166_p8 = scmp.lt.s32.totalorder %s793_s18, 3 }
   0xc   : > { %p167_p9 = pnand %p574_p7, %p166_p8 }
   0xd   : > { %v215_v0 = vld [vmem:[%s1049_s1] sm:$0xff] (!%p167_p9)  ;;  %v216_v1 = vld [vmem:[%s1049_s1 + $0x8] sm:$0xff] (!%p167_p9)  ;;  %v217_v2 = vld [vmem:[%s1049_s1 + $0x10] sm:$0xff] (!%p167_p9)  ;;  %s576_s7 = sshll.u32 (!%p167_p9), %s844_s19, 4  ;;  %vm223_vm0 = vcmask (!%p167_p9), 523264   ;;  %s189_s5 = sand.u32 (!%p167_p9), 1, %s785_s16  }
   0xe   : > { %170 = sbr.rel (%p167_p9) target bundleno = 279 (0x117), region = 36  ;;  %v666_v3 = vpack.c.bf16 (!%p167_p9), %v216_v1, %v215_v0  ;;  %v218_v4 = vld [vmem:[%s1049_s1 + $0x18] sm:$0xff] (!%p167_p9)  ;;  %p193_p10 = scmp.lt.s32.totalorder (!%p167_p9), %s576_s7, 31  ;;  %v219_v6 = vld [vmem:[%s1049_s1 + $0x20] sm:$0xff] (!%p167_p9)  ;;  %v220_v7 = vld [vmem:[%s1049_s1 + $0x28] sm:$0xff] (!%p167_p9) }
   0xf   : > { %v670_v5 = vpack.c.bf16 (!%p167_p9), %v218_v4, %v217_v2  ;;  %v674_v8 = vpack.c.bf16 (!%p167_p9), %v220_v7, %v219_v6  ;;  %v221_v9 = vld [vmem:[%s1049_s1 + $0x30] sm:$0xff] (!%p167_p9)  ;;  %v222_v10 = vld [vmem:[%s1049_s1 + $0x38] sm:$0xff] (!%p167_p9)  ;;  %v937_v28 = vld [vmem:[%s1050_s2] ss:$0 sm:$0xff] (!%p167_p9)  ;;  %s575_s10 = sshll.u32 (!%p167_p9), %s189_s5, 7  ;;  %s601_s12 = sshll.u32 (!%p167_p9), %s844_s19, 11 }
  0x10   : > { %667 = vmatprep.subr.bf16.mxu0 (!%p167_p9), %v666_v3  ;;  %682 = vmatprep.subr.bf16.mxu1 (!%p167_p9), %v666_v3  ;;  %v678_v13 = vpack.c.bf16 (!%p167_p9), %v222_v10, %v221_v9  ;;  %v942_v30 = vld [vmem:[%s1051_s3] ss:$0 sm:$0xff] (!%p167_p9)  ;;  %s958_s11 = scalar_lea.vmem (!%p167_p9), [#allocation2], %s575_s10  ;;  %s997_s20 = scalar_lea.hbm (!%p167_p9), %s1052_s4, %s601_s12 }
  0x11   : > { %669 = vmatpush3.bf16.msra.mxu0 (!%p167_p9), %v666_v3  ;;  %686 = vmatpush3.bf16.msra.mxu1 (!%p167_p9), %v666_v3  ;;  %s509_s13 = sshll.u32 (!%p167_p9), %s958_s11, 4  ;;  %s1007_s22 = scalar_lea.sflag (!%p167_p9), [#allocation3], %s189_s5  ;;  %s999_s13 = int_to_ptr.vmem [resolvable:$true] %s509_s13 }
  0x12   : > { %671 = vmatprep.subr.bf16.mxu0 (!%p167_p9), %v670_v5  ;;  %683 = vmatprep.subr.bf16.mxu1 (!%p167_p9), %v670_v5  ;;  %s731_s23 = scalar_lea.vmem (!%p167_p9), %s999_s13, 2048  ;;  %s795_s27 = smov (!%p167_p9), [#allocation2]  }
  0x13   : > { %p732_p11 = scmp.ne.s32.totalorder (!%p167_p9), %s999_s13, %s731_s23  ;;  %s735_s28 = sshll.u32 (!%p167_p9), %s795_s27, 4  ;;  %s736_s28 = int_to_ptr.vmem [resolvable:$false] %s735_s28 }
  0x14   : > { %s737_s29 = scalar_lea.vmem (!%p167_p9), %s736_s28, 4096  ;;  %p738_p0 = scmp.lt.s32.totalorder (!%p167_p9), %s999_s13, %s736_s28 }
  0x15   : > { %s1060_s7 = smov (!%p193_p10, %s576_s7), 31  ;;  %673 = vmatpush3.bf16.msra.mxu0 %v670_v5  ;;  %687 = vmatpush3.bf16.msra.mxu1 %v670_v5  ;;  %p733_p12 = pnand %p732_p11, %p861_p5 }
  0x16   : > { %s577_s14 = sshll.u32 %s1060_s7, 3  ;;  %675 = vmatprep.subr.bf16.mxu0 %v674_v8  ;;  %684 = vmatprep.subr.bf16.mxu1 %v674_v8  ;;  %p739_p1 = scmp.lt.s32.totalorder %s737_s29, %s731_s23 }
  0x17   : > { %s899_s30 = scalar_lea.vmem %s1048_s0, %s577_s14  ;;  %p734_p13 = pneg %p733_p12 }
  0x18   : > { %v199_v11 = vld [vmem:[%s899_s30] sm:$0xff]  ;;  %v200_v14 = vld [vmem:[%s899_s30 + $0x8] sm:$0xff]  ;;  %v201_v16 = vld [vmem:[%s899_s30 + $0x10] sm:$0xff]  ;;  %p740_p2 = por %p739_p1, %p738_p0 }
  0x19   : > { %v207_v12 = vld [vmem:[%s899_s30 + $0x40] sm:$0xff]  ;;  %642 = vmatprep.mubr.msk.f32.mxu0 %vm223_vm0, %v199_v11  ;;  %677 = vmatpush3.bf16.msra.mxu0 %v674_v8  ;;  %v208_v15 = vld [vmem:[%s899_s30 + $0x48] sm:$0xff]  ;;  %v209_v17 = vld [vmem:[%s899_s30 + $0x50] sm:$0xff] }
  0x1a   : > { %654 = vmatprep.mubr.msk.f32.mxu1 %vm223_vm0, %v207_v12  ;;  %688 = vmatpush3.bf16.msra.mxu1 %v674_v8  ;;  %v202_v18 = vld [vmem:[%s899_s30 + $0x18] sm:$0xff]  ;;  %v203_v20 = vld [vmem:[%s899_s30 + $0x20] sm:$0xff]  ;;  %v204_v22 = vld [vmem:[%s899_s30 + $0x28] sm:$0xff]  ;;  %p741_p3 = pnand %p740_p2, %p734_p13 }
  0x1b   : > { %679 = vmatprep.subr.bf16.mxu0 %v678_v13  ;;  %685 = vmatprep.subr.bf16.mxu1 %v678_v13  ;;  %v210_v19 = vld [vmem:[%s899_s30 + $0x58] sm:$0xff]  ;;  %v211_v21 = vld [vmem:[%s899_s30 + $0x60] sm:$0xff]  ;;  %v212_v23 = vld [vmem:[%s899_s30 + $0x68] sm:$0xff] }
  0x1c   : > { %v205_v24 = vld [vmem:[%s899_s30 + $0x30] sm:$0xff]  ;;  %v206_v26 = vld [vmem:[%s899_s30 + $0x38] sm:$0xff] }
  0x1d   : > { %681 = vmatpush3.bf16.msra.mxu0 %v678_v13  ;;  %v213_v25 = vld [vmem:[%s899_s30 + $0x70] sm:$0xff]  ;;  %v214_v27 = vld [vmem:[%s899_s30 + $0x78] sm:$0xff] }
  0x1e   : > { %689 = vmatpush3.bf16.msra.mxu1 %v678_v13 }
  0x20   : > { %643 = vmatmul.mubr.msk.f32.vlgmr.msra.gmra.mrb[0].mxu0 %vm223_vm0, %v200_v14 }
  0x21   : > { %655 = vmatmul.mubr.msk.f32.vlgmr.msra.gmra.mrb[0].mxu1 %vm223_vm0, %v208_v15  ;;  %645 = vmatprep.mubr.msk.f32.mxu0 %vm223_vm0, %v201_v16 }
  0x22   : > { %657 = vmatprep.mubr.msk.f32.mxu1 %vm223_vm0, %v209_v17 }
  0x24   : > { %646 = vmatmul.mubr.msk.f32.gmra.mrb[2].mxu0 %vm223_vm0, %v202_v18 }
  0x25   : > { %658 = vmatmul.mubr.msk.f32.gmra.mrb[2].mxu1 %vm223_vm0, %v210_v19  ;;  %648 = vmatprep.mubr.msk.f32.mxu0 %vm223_vm0, %v203_v20 }
  0x26   : > { %660 = vmatprep.mubr.msk.f32.mxu1 %vm223_vm0, %v211_v21 }
  0x28   : > { %649 = vmatmul.mubr.msk.f32.gmra.mrb[4].mxu0 %vm223_vm0, %v204_v22 }
  0x29   : > { %661 = vmatmul.mubr.msk.f32.gmra.mrb[4].mxu1 %vm223_vm0, %v212_v23  ;;  %651 = vmatprep.mubr.msk.f32.mxu0 %vm223_vm0, %v205_v24 }
  0x2a   : > { %663 = vmatprep.mubr.msk.f32.mxu1 %vm223_vm0, %v213_v25 }
  0x2c   : > { %652 = vmatmul.mubr.msk.f32.gmra.mrb[6].mxu0 %vm223_vm0, %v206_v26 }
  0x2d   : > { %664 = vmatmul.mubr.msk.f32.gmra.mrb[6].mxu1 %vm223_vm0, %v214_v27 }
  0xf3   : > { %v644_v29 = vpop.f32.mrb[0].mxu0 }
  0xf4   : > { %v656_v31 = vpop.f32.mrb[0].mxu1  ;;  %v425_v32 = vmul.f32 %v644_v29, %v937_v28  ;;  %v338_v34 = vpop.f32.mrb[1].mxu0 }
  0xf5   : > { %v433_v33 = vmul.f32 %v656_v31, %v937_v28  ;;  %v378_v35 = vpop.f32.mrb[1].mxu1  ;;  %v424_v36 = vmul.f32 %v937_v28, %v338_v34 }
  0xf6   : > { %v432_v37 = vmul.f32 %v937_v28, %v378_v35  ;;  %v448_v38 = vadd.f32 %v942_v30, %v425_v32 }
  0xf7   : > { %v456_v39 = vadd.f32 %v942_v30, %v433_v33  ;;  %v447_v40 = vadd.f32 %v942_v30, %v424_v36  ;;  %v647_v42 = vpop.f32.mrb[2].mxu0 }
  0xf8   : > { %v455_v41 = vadd.f32 %v942_v30, %v432_v37  ;;  %v659_v43 = vpop.f32.mrb[2].mxu1  ;;  %v464_v44 = vmax.f32 %v448_v38, 0.0  ;;  %v427_v46 = vmul.f32 %v647_v42, %v937_v28  ;;  %v348_v48 = vpop.f32.mrb[3].mxu0 }
  0xf9   : > { %v472_v45 = vmax.f32 %v456_v39, 0.0  ;;  %v435_v47 = vmul.f32 %v659_v43, %v937_v28  ;;  %v388_v49 = vpop.f32.mrb[3].mxu1  ;;  %v463_v50 = vmax.f32 %v447_v40, 0.0  ;;  %v426_v52 = vmul.f32 %v937_v28, %v348_v48 }
  0xfa   : > { %v471_v51 = vmax.f32 %v455_v41, 0.0  ;;  %v434_v53 = vmul.f32 %v937_v28, %v388_v49  ;;  %480 = vst [vmem:[%s958_s11 + $0x8] sm:$0xff] %v464_v44  ;;  %v450_v54 = vadd.f32 %v942_v30, %v427_v46 }
  0xfb   : > { %488 = vst [vmem:[%s958_s11 + $0x48] sm:$0xff] %v472_v45  ;;  %v458_v55 = vadd.f32 %v942_v30, %v435_v47  ;;  %479 = vst [vmem:[%s958_s11] sm:$0xff] %v463_v50  ;;  %v449_v56 = vadd.f32 %v942_v30, %v426_v52  ;;  %v650_v58 = vpop.f32.mrb[4].mxu0 }
  0xfc   : > { %487 = vst [vmem:[%s958_s11 + $0x40] sm:$0xff] %v471_v51  ;;  %v457_v57 = vadd.f32 %v942_v30, %v434_v53  ;;  %v662_v59 = vpop.f32.mrb[4].mxu1  ;;  %v466_v60 = vmax.f32 %v450_v54, 0.0  ;;  %v429_v62 = vmul.f32 %v650_v58, %v937_v28  ;;  %v358_v0 = vpop.f32.mrb[5].mxu0 }
  0xfd   : > { %v474_v61 = vmax.f32 %v458_v55, 0.0  ;;  %v437_v63 = vmul.f32 %v662_v59, %v937_v28  ;;  %v398_v1 = vpop.f32.mrb[5].mxu1  ;;  %v465_v2 = vmax.f32 %v449_v56, 0.0  ;;  %v428_v4 = vmul.f32 %v937_v28, %v358_v0 }
  0xfe   : > { %v473_v3 = vmax.f32 %v457_v57, 0.0  ;;  %v436_v5 = vmul.f32 %v937_v28, %v398_v1  ;;  %482 = vst [vmem:[%s958_s11 + $0x18] sm:$0xff] %v466_v60  ;;  %v452_v6 = vadd.f32 %v942_v30, %v429_v62 }
  0xff   : > { %490 = vst [vmem:[%s958_s11 + $0x58] sm:$0xff] %v474_v61  ;;  %v460_v7 = vadd.f32 %v942_v30, %v437_v63  ;;  %481 = vst [vmem:[%s958_s11 + $0x10] sm:$0xff] %v465_v2  ;;  %v451_v8 = vadd.f32 %v942_v30, %v428_v4  ;;  %v653_v10 = vpop.f32.mrb[6].mxu0 }
 0x100   : > { %489 = vst [vmem:[%s958_s11 + $0x50] sm:$0xff] %v473_v3  ;;  %v459_v9 = vadd.f32 %v942_v30, %v436_v5  ;;  %v665_v11 = vpop.f32.mrb[6].mxu1  ;;  %v468_v12 = vmax.f32 %v452_v6, 0.0  ;;  %v431_v14 = vmul.f32 %v653_v10, %v937_v28  ;;  %v368_v16 = vpop.f32.mrb[7].mxu0 }
 0x101   : > { %v476_v13 = vmax.f32 %v460_v7, 0.0  ;;  %v439_v15 = vmul.f32 %v665_v11, %v937_v28  ;;  %v408_v17 = vpop.f32.mrb[7].mxu1  ;;  %v467_v18 = vmax.f32 %v451_v8, 0.0  ;;  %v430_v20 = vmul.f32 %v937_v28, %v368_v16 }
 0x102   : > { %v475_v19 = vmax.f32 %v459_v9, 0.0  ;;  %v438_v21 = vmul.f32 %v937_v28, %v408_v17  ;;  %484 = vst [vmem:[%s958_s11 + $0x28] sm:$0xff] %v468_v12  ;;  %v454_v22 = vadd.f32 %v942_v30, %v431_v14 }
 0x103   : > { %492 = vst [vmem:[%s958_s11 + $0x68] sm:$0xff] %v476_v13  ;;  %v462_v23 = vadd.f32 %v942_v30, %v439_v15  ;;  %483 = vst [vmem:[%s958_s11 + $0x20] sm:$0xff] %v467_v18  ;;  %v453_v24 = vadd.f32 %v942_v30, %v430_v20 }
 0x104   : > { %491 = vst [vmem:[%s958_s11 + $0x60] sm:$0xff] %v475_v19  ;;  %v461_v25 = vadd.f32 %v942_v30, %v438_v21  ;;  %v470_v26 = vmax.f32 %v454_v22, 0.0 }
 0x105   : > { %v478_v27 = vmax.f32 %v462_v23, 0.0  ;;  %v469_v28 = vmax.f32 %v453_v24, 0.0 }
 0x106   : > { %v477_v29 = vmax.f32 %v461_v25, 0.0  ;;  %486 = vst [vmem:[%s958_s11 + $0x38] sm:$0xff] %v470_v26 }
 0x107   : > { %494 = vst [vmem:[%s958_s11 + $0x78] sm:$0xff] %v478_v27  ;;  %485 = vst [vmem:[%s958_s11 + $0x30] sm:$0xff] %v469_v28 }
 0x108   : > { %493 = vst [vmem:[%s958_s11 + $0x70] sm:$0xff] %v477_v29 }
 0x109   : > { %744 = shalt.err (!%p741_p3)
}
 0x10a   : > { %s745_s30 = scalar_lea.hbm %s997_s20, 2048  ;;  %s749_s7 = scalar_lea.hbm %s1052_s4, 4096 }
 0x10b   : > { %p746_p4 = scmp.ne.s32.totalorder %s997_s20, %s745_s30  ;;  %p750_p9 = scmp.lt.u32.totalorder %s997_s20, %s1052_s4 }
 0x10c   : > { %p751_p10 = scmp.lt.u32.totalorder %s749_s7, %s745_s30  ;;  %p753_p12 = scmp.lt.u32.totalorder %s745_s30, %s997_s20 }
 0x10d   : > { %p747_p7 = pnand %p746_p4, %p861_p5 }
 0x10e   : > { %p752_p11 = por %p751_p10, %p750_p9 }
 0x10f   : > { %p748_p8 = pneg %p747_p7 }
 0x110   : > { %p754_p13 = por %p753_p12, %p752_p11 }
 0x112   : > { %p755_p0 = pnand %p754_p13, %p748_p8 }
 0x114   : > { %758 = shalt.err (!%p755_p0)
}
 0x115   : > { %s796_s10 = smov 128   ;;  %s797_s11 = smov 8  }
 0x116   : > { %690 = dma.vmem_to_hbm [thread:$0]  (%p861_p5), %s999_s13, 2048, %s997_s20, %s1007_s22, %s796_s10, %s796_s10, %s797_s11  }
 0x117 PF: > { %p696_p1 = scmp.ge.s32.totalorder %s793_s18, 2  ;;  %s524_s12 = sand.u32 1, %s781_s15  }
 0x118   : > { %s525_s19 = scalar_lea.sflag [#allocation3], %s524_s12 }
 0x119   : > { %p693_p2 = pnand %p696_p1, %p865_p6 }
 0x11b   : > { %776 = dma.done.wait (!%p693_p2), %s525_s19, 2048  }
 0x11c   : > { %778 = vsyncadd (!%p693_p2), %s525_s19, 4294965248  ;;  %p14_p3 = scmp.ge.s32.totalorder %s848_s21, 4   ;;  %s1055_s15 = smov %s785_s16 }
 0x11d   : > { %s1056_s16 = smov %s789_s17  ;;  %s1057_s17 = smov %s859_s24 }
 0x11e   : > { %s1058_s18 = smov %s848_s21  ;;  %16 = sbr.rel (!%p14_p3) target bundleno = 3 (0x3), region = 71 }
 0x125   :  { %530 = vsyncpa [#allocation3], 1 }
 0x126   :  { %532 = vsyncpa [#allocation3 + $0x1], 1 }

</bundles_post_ra>
